<compile_context>
chip_gen: v6e
topology: v6e:2x2x1
jax: 0.10.0
libtpu: 0.0.40
codegen_flags: <defaults>
</compile_context>

<pallas_src>
import functools

import jax
import jax.numpy as jnp
from jax.experimental import pallas as pl
from jax.experimental.pallas import tpu as pltpu


def _round_up(x, m):
    return ((x + m - 1) // m) * m


@functools.lru_cache(maxsize=1)
def _tpu_kind() -> str:
    try:
        return jax.devices()[0].device_kind.lower()
    except Exception:
        return ""


@functools.lru_cache(maxsize=1)
def _vmem_cap_bytes() -> int:
    kind = _tpu_kind()
    if any(t in kind for t in ("v4", "v5", "v6")):
        phys = 128 << 20
    else:
        phys = 64 << 20            # v7x (64 MiB/TC) and unknown chips: conservative
    return (phys * 3) // 4         # leave headroom for compiler scratch / spill


@functools.lru_cache(maxsize=1)
def _bf16_activation() -> bool:
    # v6e / v7x have a bf16 VPU/EUP path; v5e (and older / unknown) do not.
    kind = _tpu_kind()
    return any(t in kind for t in ("v6", "v7", "7x"))


@functools.lru_cache(maxsize=1)
def _supports_pipeline_mode() -> bool:
    if not hasattr(pl, "Buffered"):
        return False
    try:
        pl.BlockSpec((8, 128), lambda i: (0, 0), pipeline_mode=pl.Buffered(1))
        return True
    except TypeError:
        return False


def ff_kernel(x_ref, w1_ref, b1_ref, w2_ref, b2_ref, w3_ref, b3_ref, o_ref,
              *, vpu_final, act_dtype):
    # In-kernel bf16 cast of x: VPU work hidden under MXU slack; avoids a
    # wrapper-side cast that would round-trip x through HBM.
    x_bf = x_ref[...].astype(w1_ref.dtype)

    # Layer 1: bf16 MXU matmul, f32 accumulate + bias.  tanh in act_dtype
    # (bf16 on v6e/v7x, f32 on v5e); result is already the next MXU's dtype.
    z1 = (jnp.dot(x_bf, w1_ref[...], preferred_element_type=jnp.float32)
          + b1_ref[...])
    h1 = jnp.tanh(z1.astype(act_dtype))

    # Layer 2.
    z2 = (jnp.dot(h1.astype(w2_ref.dtype), w2_ref[...],
                  preferred_element_type=jnp.float32) + b2_ref[...])
    h2 = jnp.tanh(z2.astype(act_dtype))

    if vpu_final:
        # out_dim == 1: w3 arrives pre-transposed as a (1, hidden) row.
        # VPU multiply + cross-lane reduce beats a degenerate N=1 MXU matmul
        # (which would waste 255/256 MXU columns and force masked stores).
        w3_row = w3_ref[...].astype(jnp.float32)
        out = (jnp.sum(h2.astype(jnp.float32) * w3_row, axis=-1, keepdims=True)
               + b3_ref[...])
    else:
        out = (jnp.dot(h2.astype(w3_ref.dtype), w3_ref[...],
                       preferred_element_type=jnp.float32) + b3_ref[...])
    o_ref[...] = out.astype(o_ref.dtype)
    # TODO(synk): for out_dim == 1 a lane-dense (1, tb) output layout would
    # avoid masked 1-lane stores; the absolute win is tiny (B*4 bytes).


def prepare_params(params):
    """One-time conversion of f32 nn.Linear params into kernel dtypes.

    Hoisted out of feedforward() so per-call weight traffic is only the
    kernel's own bf16 weight DMA (no per-call f32->bf16 HBM round trip).
    """
    w3 = params["w3"]
    out_dim = w3.shape[1]
    vpu_final = out_dim == 1
    return {
        "w1": jnp.asarray(params["w1"], jnp.bfloat16),
        "b1": jnp.asarray(params["b1"], jnp.float32),
        "w2": jnp.asarray(params["w2"], jnp.bfloat16),
        "b2": jnp.asarray(params["b2"], jnp.float32),
        # out_dim == 1: store w3 as a (1, hidden) row for the VPU reduce path.
        "w3": jnp.asarray(w3.T if vpu_final else w3, jnp.bfloat16),
        "b3": jnp.asarray(params["b3"], jnp.float32),
        "vpu_final": vpu_final,
        "out_dim": out_dim,
    }


def feedforward(x, prepared, *, tile_b=256):
    """x: [B, in_dim] f32.  prepared: output of prepare_params()."""
    B, in_dim = x.shape
    w1b, b1f = prepared["w1"], prepared["b1"]
    w2b, b2f = prepared["w2"], prepared["b2"]
    w3b, b3f = prepared["w3"], prepared["b3"]
    vpu_final = prepared["vpu_final"]
    out_dim = prepared["out_dim"]
    h0, h1_dim = w1b.shape[1], w2b.shape[1]
    out_dtype = x.dtype

    # ---- batch tiling (no padding: cdiv grid + masked partial last block) ---
    tb = max(8, min(tile_b, _round_up(B, 8)))
    steps = pl.cdiv(B, tb)
    # v7x megacore: prefer an even step count when the shrunk tile still fills
    # the 256-row MXU, so both TensorCores get equal work.
    if steps > 1 and steps % 2 == 1:
        cand = _round_up(pl.cdiv(B, steps + 1), 8)
        if cand >= 128:
            tb = cand
            steps = pl.cdiv(B, tb)
    grid = (steps,)

    act_dtype = jnp.bfloat16 if _bf16_activation() else jnp.float32
    kernel = functools.partial(ff_kernel, vpu_final=vpu_final,
                               act_dtype=act_dtype)

    cost = pl.CostEstimate(
        flops=2 * B * (in_dim * h0 + h0 * h1_dim + h1_dim * out_dim),
        transcendentals=B * (h0 + h1_dim),
        bytes_accessed=(x.size * 4
                        + (w1b.size + w2b.size + w3b.size) * 2
                        + (b1f.size + b2f.size + b3f.size) * 4
                        + B * out_dim * 4),
    )

    weight_bytes = ((w1b.size + w2b.size + w3b.size) * 2
                    + (b1f.size + b2f.size + b3f.size) * 4)
    # Only single-buffer resident weights when the saved VMEM matters; small
    # weights stay on the plain, maximally-supported BlockSpec path.
    want_single_buffer = _supports_pipeline_mode() and weight_bytes > (4 << 20)

    out_shape = jax.ShapeDtypeStruct((B, out_dim), out_dtype)
    x_spec = pl.BlockSpec((tb, in_dim), lambda i: (i, 0))
    out_spec = pl.BlockSpec((tb, out_dim), lambda i: (i, 0))

    def const_spec(shape, single_buffer):
        idx = lambda i: (0,) * len(shape)
        if single_buffer:
            # Grid-invariant operand: single-buffer (halves weight VMEM, it is
            # never re-fetched across the batch grid).
            return pl.BlockSpec(shape, idx, pipeline_mode=pl.Buffered(1))
        return pl.BlockSpec(shape, idx)

    def build(single_buffer_weights):
        wbuf = 1 if single_buffer_weights else 2
        need = (wbuf * weight_bytes
                + 2 * tb * in_dim * 4          # double-buffered f32 x tiles
                + 2 * tb * out_dim * 4         # double-buffered out tiles
                + tb * (h0 + h1_dim) * 4       # f32 intermediates (upper bound)
                + (4 << 20))                   # headroom
        vmem_limit = min(max(32 << 20, int(need)), _vmem_cap_bytes())
        return pl.pallas_call(
            kernel,
            out_shape=out_shape,
            grid_spec=pltpu.PrefetchScalarGridSpec(
                num_scalar_prefetch=0,
                grid=grid,
                in_specs=[
                    x_spec,
                    const_spec(w1b.shape, single_buffer_weights),
                    const_spec(b1f.shape, single_buffer_weights),
                    const_spec(w2b.shape, single_buffer_weights),
                    const_spec(b2f.shape, single_buffer_weights),
                    const_spec(w3b.shape, single_buffer_weights),
                    const_spec(b3f.shape, single_buffer_weights),
                ],
                out_specs=out_spec,
            ),
            compiler_params=pltpu.CompilerParams(
                dimension_semantics=("parallel",),
                vmem_limit_bytes=vmem_limit,
            ),
            cost_estimate=cost,
        )

    args = (x, w1b, b1f, w2b, b2f, w3b, b3f)
    if want_single_buffer:
        try:
            return build(single_buffer_weights=True)(*args)
        except Exception:
            # Only reachable when pipeline_mode=Buffered(1) was requested.
            # Genuine kernel bugs re-surface in the fallback below (identical
            # kernel, just default buffering), and the fallback's VMEM budget
            # already accounts for double-buffered weights, so it cannot
            # silently blow the v7x limit.
            pass
    return build(single_buffer_weights=False)(*args)


def init_params(key, in_dim, hidden_sizes, out_dim):
    """Deterministic synthetic init (uniform, like nn.Linear's default range)."""
    dims = [in_dim] + list(hidden_sizes) + [out_dim]
    params = {}
    for idx in range(len(dims) - 1):
        fan_in, fan_out = dims[idx], dims[idx + 1]
        key, kw, kb = jax.random.split(key, 3)
        bound = 1.0 / jnp.sqrt(jnp.float32(fan_in))
        params[f"w{idx + 1}"] = jax.random.uniform(
            kw, (fan_in, fan_out), jnp.float32, -bound, bound)
        params[f"b{idx + 1}"] = jax.random.uniform(
            kb, (1, fan_out), jnp.float32, -bound, bound)
    return params


if __name__ == "__main__":
    key = jax.random.PRNGKey(0)
    B, in_dim = 16, 32
    hidden_sizes = [64, 32]     # scaled-down analogue of the default [3072, 1024]
    out_dim = 1

    k_x, k_p = jax.random.split(key)
    x = jax.random.normal(k_x, (B, in_dim), jnp.float32)
    params = init_params(k_p, in_dim, hidden_sizes, out_dim)
    prepared = prepare_params(params)   # one-time bf16 conversion (hoisted)

    out = jax.block_until_ready(feedforward(x, prepared))
    assert out.shape == (B, out_dim)

    # Eval-mode module semantics in f32 (dropout = identity); tolerance covers
    # the kernel's bf16 MXU operands / bf16 tanh on v6e/v7x.
    h = jnp.tanh(x @ params["w1"] + params["b1"])
    h = jnp.tanh(h @ params["w2"] + params["b2"])
    ref = h @ params["w3"] + params["b3"]
    assert jnp.allclose(out, ref, atol=5e-2, rtol=5e-2), \
        float(jnp.max(jnp.abs(out - ref)))

    print("KERNEL_OK")
</pallas_src>

<mosaic_0001>
module attributes {stable_mosaic.version = 11 : i64} {
  func.func @ff_kernel(%arg0: i32, %arg1: memref<16x32xf32, #tpu.memory_space<vmem>>, %arg2: memref<32x64xbf16, #tpu.memory_space<vmem>>, %arg3: memref<1x64xf32, #tpu.memory_space<vmem>>, %arg4: memref<64x32xbf16, #tpu.memory_space<vmem>>, %arg5: memref<1x32xf32, #tpu.memory_space<vmem>>, %arg6: memref<1x32xbf16, #tpu.memory_space<vmem>>, %arg7: memref<1x1xf32, #tpu.memory_space<vmem>>, %arg8: memref<16x1xf32, #tpu.memory_space<vmem>>) attributes {dimension_semantics = [#tpu.dimension_semantics<parallel>], iteration_bounds = array<i64: 1>, scalar_prefetch = 0 : i64, scratch_operands = 0 : i64, tpu.core_type = #tpu.core_type<tc>, window_params = [{transform_indices = @transform_0, window_bounds = array<i64: 16, 32>}, {pipeline_mode = #tpu.pipeline_mode<synchronous>, transform_indices = @transform_1, window_bounds = array<i64: 32, 64>}, {pipeline_mode = #tpu.pipeline_mode<synchronous>, transform_indices = @transform_2, window_bounds = array<i64: 1, 64>}, {pipeline_mode = #tpu.pipeline_mode<synchronous>, transform_indices = @transform_3, window_bounds = array<i64: 64, 32>}, {pipeline_mode = #tpu.pipeline_mode<synchronous>, transform_indices = @transform_4, window_bounds = array<i64: 1, 32>}, {pipeline_mode = #tpu.pipeline_mode<synchronous>, transform_indices = @transform_5, window_bounds = array<i64: 1, 32>}, {pipeline_mode = #tpu.pipeline_mode<synchronous>, transform_indices = @transform_6, window_bounds = array<i64: 1, 1>}, {transform_indices = @transform_7, window_bounds = array<i64: 16, 1>}]} {
    %c0 = arith.constant 0 : index
    %c0_0 = arith.constant 0 : index
    %0 = vector.load %arg1[%c0, %c0_0] : memref<16x32xf32, #tpu.memory_space<vmem>>, vector<16x32xf32>
    %1 = arith.truncf %0 : vector<16x32xf32> to vector<16x32xbf16>
    %c0_1 = arith.constant 0 : index
    %c0_2 = arith.constant 0 : index
    %2 = vector.load %arg2[%c0_1, %c0_2] : memref<32x64xbf16, #tpu.memory_space<vmem>>, vector<32x64xbf16>
    %cst = arith.constant dense<0.000000e+00> : vector<16x64xf32>
    %3 = tpu.matmul %1, %2, %cst {dimension_numbers = #tpu.dot_dimension_numbers<[1], [0], [0], [1], [0, 0, 1, 1], [], []>} : vector<16x32xbf16>, vector<32x64xbf16>, vector<16x64xf32> -> vector<16x64xf32>
    %c0_3 = arith.constant 0 : index
    %c0_4 = arith.constant 0 : index
    %4 = vector.load %arg3[%c0_3, %c0_4] : memref<1x64xf32, #tpu.memory_space<vmem>>, vector<1x64xf32>
    %5 = vector.broadcast %4 : vector<1x64xf32> to vector<16x64xf32>
    %6 = arith.addf %3, %5 : vector<16x64xf32>
    %7 = math.tanh %6 : vector<16x64xf32>
    %8 = arith.truncf %7 : vector<16x64xf32> to vector<16x64xbf16>
    %c0_5 = arith.constant 0 : index
    %c0_6 = arith.constant 0 : index
    %9 = vector.load %arg4[%c0_5, %c0_6] : memref<64x32xbf16, #tpu.memory_space<vmem>>, vector<64x32xbf16>
    %cst_7 = arith.constant dense<0.000000e+00> : vector<16x32xf32>
    %10 = tpu.matmul %8, %9, %cst_7 {dimension_numbers = #tpu.dot_dimension_numbers<[1], [0], [0], [1], [0, 0, 1, 1], [], []>} : vector<16x64xbf16>, vector<64x32xbf16>, vector<16x32xf32> -> vector<16x32xf32>
    %c0_8 = arith.constant 0 : index
    %c0_9 = arith.constant 0 : index
    %11 = vector.load %arg5[%c0_8, %c0_9] : memref<1x32xf32, #tpu.memory_space<vmem>>, vector<1x32xf32>
    %12 = vector.broadcast %11 : vector<1x32xf32> to vector<16x32xf32>
    %13 = arith.addf %10, %12 : vector<16x32xf32>
    %14 = math.tanh %13 : vector<16x32xf32>
    %c0_10 = arith.constant 0 : index
    %c0_11 = arith.constant 0 : index
    %15 = vector.load %arg6[%c0_10, %c0_11] : memref<1x32xbf16, #tpu.memory_space<vmem>>, vector<1x32xbf16>
    %16 = arith.extf %15 : vector<1x32xbf16> to vector<1x32xf32>
    %17 = vector.broadcast %16 : vector<1x32xf32> to vector<16x32xf32>
    %18 = arith.mulf %14, %17 : vector<16x32xf32>
    %cst_12 = arith.constant dense<0.000000e+00> : vector<16xf32>
    %19 = vector.multi_reduction <add>, %18, %cst_12 [1] : vector<16x32xf32> to vector<16xf32>
    %20 = vector.shape_cast %19 : vector<16xf32> to vector<16x1xf32>
    %c0_13 = arith.constant 0 : index
    %c0_14 = arith.constant 0 : index
    %21 = vector.load %arg7[%c0_13, %c0_14] : memref<1x1xf32, #tpu.memory_space<vmem>>, vector<1x1xf32>
    %22 = vector.broadcast %21 : vector<1x1xf32> to vector<16x1xf32>
    %23 = arith.addf %20, %22 : vector<16x1xf32>
    %c0_15 = arith.constant 0 : index
    %c0_16 = arith.constant 0 : index
    %24 = vector.load %arg8[%c0_15, %c0_16] : memref<16x1xf32, #tpu.memory_space<vmem>>, vector<16x1xf32>
    tpu.vector_store %arg8[%c0_15, %c0_16], %23 {strides = array<i32>} : memref<16x1xf32, #tpu.memory_space<vmem>>, vector<16x1xf32>,
    return
  }
  func.func @transform_0(%arg0: i32) -> (i32, i32) {
    %c0_i32 = arith.constant 0 : i32
    %c0_i32_0 = arith.constant 0 : i32
    return %arg0, %c0_i32 : i32, i32
  }
  func.func @transform_1(%arg0: i32) -> (i32, i32) {
    %c0_i32 = arith.constant 0 : i32
    %c0_i32_0 = arith.constant 0 : i32
    %c0_i32_1 = arith.constant 0 : i32
    return %c0_i32, %c0_i32_0 : i32, i32
  }
  func.func @transform_2(%arg0: i32) -> (i32, i32) {
    %c0_i32 = arith.constant 0 : i32
    %c0_i32_0 = arith.constant 0 : i32
    %c0_i32_1 = arith.constant 0 : i32
    return %c0_i32, %c0_i32_0 : i32, i32
  }
  func.func @transform_3(%arg0: i32) -> (i32, i32) {
    %c0_i32 = arith.constant 0 : i32
    %c0_i32_0 = arith.constant 0 : i32
    %c0_i32_1 = arith.constant 0 : i32
    return %c0_i32, %c0_i32_0 : i32, i32
  }
  func.func @transform_4(%arg0: i32) -> (i32, i32) {
    %c0_i32 = arith.constant 0 : i32
    %c0_i32_0 = arith.constant 0 : i32
    %c0_i32_1 = arith.constant 0 : i32
    return %c0_i32, %c0_i32_0 : i32, i32
  }
  func.func @transform_5(%arg0: i32) -> (i32, i32) {
    %c0_i32 = arith.constant 0 : i32
    %c0_i32_0 = arith.constant 0 : i32
    %c0_i32_1 = arith.constant 0 : i32
    return %c0_i32, %c0_i32_0 : i32, i32
  }
  func.func @transform_6(%arg0: i32) -> (i32, i32) {
    %c0_i32 = arith.constant 0 : i32
    %c0_i32_0 = arith.constant 0 : i32
    %c0_i32_1 = arith.constant 0 : i32
    return %c0_i32, %c0_i32_0 : i32, i32
  }
  func.func @transform_7(%arg0: i32) -> (i32, i32) {
    %c0_i32 = arith.constant 0 : i32
    %c0_i32_0 = arith.constant 0 : i32
    return %arg0, %c0_i32 : i32, i32
  }
}

</mosaic_0001>

<bundles_post_ra>
// kernel: tpu_custom_call.1
= control target key start
LH: loop header
LB: loop body
LE: loop exit
PB: predicated region body
PF: predicated region fallthrough
CT: control target
= control target key end

     0   :  { %v274_v0 = vmov 0.0   ;;  %vm275_vm0 = vmmov 0   ;;  %vm55_vm1 = vcmask 261120   ;;  %vm142_vm2 = vcmask 523264   ;;  %s361_s1 = inlined_call_operand.vmem [shape: bf16[32,64], index: 1, kind: input, shape index: {}]   ;;  %s362_s0 = inlined_call_operand.vmem [shape: f32[16,32], index: 0, kind: input, shape index: {}]   ;;  %s363_s3 = inlined_call_operand.vmem [shape: bf16[64,32], index: 3, kind: input, shape index: {}]   ;;  %s364_s2 = inlined_call_operand.vmem [shape: f32[1,64], index: 2, kind: input, shape index: {}]   ;;  %s365_s6 = inlined_call_operand.<no memory space> [shape: f32[1,1], index: 6, kind: input, shape index: {}]   ;;  %s366_s4 = inlined_call_operand.vmem [shape: f32[1,32], index: 4, kind: input, shape index: {}]   ;;  %s367_s5 = inlined_call_operand.vmem [shape: bf16[1,32], index: 5, kind: input, shape index: {}]   ;;  %s368_s7 = inlined_call_operand.vmem [shape: f32[16,1], index: 7, kind: output, shape index: {}]  }
   0x1   :  { %238 = vmatprep.subr.bf16.mxu0 %v274_v0  ;;  %v260_v1 = vld [vmem:[%s361_s1 + $0x8] sm:$0xff]   ;;  %242 = vmatprep.mubr.msk.bf16.mxu0 %vm275_vm0, %v274_v0  ;;  %v261_v2 = vld [vmem:[%s361_s1] sm:$0xff]   ;;  %v262_v6 = vld [vmem:[%s363_s3 + $0x18] sm:$0xff]   ;;  %v12_v20 = vstv %s365_s6  ;;  %v191_v24 = vlaneseq  ;;  %vm212_vm3 = vcmask 7168  }
   0x2   :  { %246 = vmatprep.subr.bf16.mxu1 %v274_v0  ;;  %254 = vmatprep.mubr.msk.bf16.mxu1 %vm275_vm0, %v274_v0  ;;  %v29_v3 = vld [vmem:[%s362_s0] sm:$0xff]  ;;  %v30_v4 = vld [vmem:[%s362_s0 + $0x8] sm:$0xff]  ;;  %v263_v7 = vld [vmem:[%s363_s3 + $0x10] sm:$0xff]   ;;  %13 = vst [vmem:[#allocation2] sm:$0x1] %v12_v20 }
   0x3   :  { %239 = vmatpush3.bf16.msra.mxu0 %v260_v1  ;;  %v31_v5 = vpack.c.bf16 %v30_v4, %v29_v3  ;;  %247 = vmatpush3.bf16.msra.mxu1 %v262_v6  ;;  %v264_v8 = vld [vmem:[%s363_s3 + $0x8] sm:$0xff]   ;;  %v265_v9 = vld [vmem:[%s363_s3] sm:$0xff]   ;;  %v192_v28 = vshrl.u32 %v191_v24, 7 }
   0x4   :  { %240 = vmatprep.subr.bf16.mxu0 %v274_v0  ;;  %248 = vmatprep.subr.bf16.mxu1 %v274_v0  ;;  %v219_v10 = vld [vmem:[%s364_s2] ss:$0 sm:$0xff] }
   0x5   :  { %v223_v21 = vld [vmem:[%s366_s4] ss:$0 sm:$0xff]  ;;  %v193_v32 = vsub.s32 0, %v192_v28 }
   0x6   :  { %v189_v30 = vld [vmem:[%s367_s5] sm:$0x1] }
   0x7   :  { %241 = vmatpush3.bf16.msra.mxu0 %v261_v2  ;;  %249 = vmatpush3.bf16.msra.mxu1 %v263_v7  ;;  %v190_v31 = vunpack.c.l.bf16 %v189_v30 }
   0x8   :  { %250 = vmatprep.subr.bf16.mxu1 %v274_v0 }
   0x9   :  { %v194_v33 = vrot.slane %v190_v31, %v193_v32  ;;  %v229_v40 = vld [vmem:[#allocation2] ss:$0 sm:$0xff] }
   0xa   :  { %243 = vmatmul.mubr.msk.bf16.vlgmr.msra.gmra.mxu0 %vm55_vm1, %v31_v5 }
   0xb   :  { %251 = vmatpush3.bf16.msra.mxu1 %v264_v8 }
   0xc   :  { %252 = vmatprep.subr.bf16.mxu1 %v274_v0 }
   0xf   :  { %253 = vmatpush3.bf16.msra.mxu1 %v265_v9 }
  0xca   :  { %v93_v11 = vpop.f32.mrf.mxu0 }
  0xcb   :  { %v94_v12 = vadd.f32 %v219_v10, %v93_v11 }
  0xcc   :  { %v244_v13 = vpop.f32.mrf.mxu0 }
  0xcd   :  { %266 = vtanh.f32 %v94_v12 }
  0xce   :  { %v96_v14 = vpop.f32.mrf.mxu0 }
  0xcf   :  { %v97_v15 = vadd.f32 %v219_v10, %v96_v14 }
  0xd0   :  { %v245_v16 = vpop.f32.mrf.mxu0 }
  0xd1   :  { %268 = vtanh.f32 %v97_v15 }
  0xda   :  { %v267_v17 = vpop.eup %266 }
  0xde   :  { %v269_v18 = vpop.eup %268 }
  0xdf   :  { %v102_v19 = vpack.c.bf16 %v269_v18, %v267_v17 }
  0xe1   :  { %255 = vmatmul.mubr.msk.bf16.vlgmr.msra.gmra.mxu1 %vm142_vm2, %v102_v19 }
 0x1a1   :  { %v180_v22 = vpop.f32.mrf.mxu1 }
 0x1a2   :  { %v181_v23 = vadd.f32 %v223_v21, %v180_v22 }
 0x1a3   :  { %v256_v25 = vpop.f32.mrf.mxu1 }
 0x1a4   :  { %270 = vtanh.f32 %v181_v23 }
 0x1a5   :  { %v183_v26 = vpop.f32.mrf.mxu1 }
 0x1a6   :  { %v184_v27 = vadd.f32 %v223_v21, %v183_v26 }
 0x1a7   :  { %v257_v29 = vpop.f32.mrf.mxu1 }
 0x1a8   :  { %272 = vtanh.f32 %v184_v27 }
 0x1b1   :  { %v271_v34 = vpop.eup %270 }
 0x1b2   :  { %v195_v35 = vmul.f32 %v271_v34, %v194_v33 }
 0x1b4   :  { %v197_v36 = vsel %vm55_vm1, %v195_v35, 0.0 }
 0x1b5   :  { %v273_v37 = vpop.eup %272  ;;  %198 = vadd.xlane.f32.xlu0 %v197_v36 }
 0x1b6   :  { %v196_v38 = vmul.f32 %v273_v37, %v194_v33 }
 0x1b8   :  { %v200_v39 = vsel %vm55_vm1, %v196_v38, 0.0 }
 0x1b9   :  { %201 = vadd.xlane.f32.xlu0 %v200_v39 }
 0x23e   :  { %v199_v41 = vpop.xlane.xlu0 %198 }
 0x23f   :  { %v210_v42 = vadd.f32 %v229_v40, %v199_v41 }
 0x241   :  { %213 = vst.msk [vmem:[%s368_s7] sm:$0xff] %vm212_vm3, %v210_v42 }
 0x242   :  { %v202_v43 = vpop.xlane.xlu0 %201 }
 0x243   :  { %v211_v44 = vadd.f32 %v229_v40, %v202_v43 }
 0x245   :  { %214 = vst.msk [vmem:[%s368_s7 + $0x8] sm:$0xff] %vm212_vm3, %v211_v44 }

</bundles_post_ra>
